<compile_context>
chip_gen: v6e
topology: v6e:2x2x1
jax: 0.10.0
libtpu: 0.0.40
codegen_flags: <defaults>
</compile_context>

<pallas_src>
import jax
import jax.numpy as jnp
from jax.experimental import pallas as pl
from jax.experimental.pallas import tpu as pltpu


def _round_up(x, m):
    return (x + m - 1) // m * m


def _mlp_kernel(xT_ref, w1_ref, b1_ref, w2_ref, b2_ref, o_ref):
    # xT_ref: (D_in, TB)  current batch tile, batch on the 128-lane axis
    # w1_ref: (H, D_in)   resident layer-1 weight (torch convention)
    # b1_ref: (H, 1)      resident layer-1 bias (broadcasts over lanes)
    # w2_ref: (H, 1)      resident layer-2 weight column
    # b2_ref: (1, 1)      scalar, SMEM
    # o_ref : (1, TB)     lane-dense output tile
    h = jnp.dot(w1_ref[...], xT_ref[...],
                preferred_element_type=jnp.float32)          # (H, TB) on MXU
    h = jnp.maximum(h + b1_ref[...], 0.0)                    # bias + ReLU (VPU)
    # Layer 2 as VPU multiply + XLU sublane reduce (no N=1 MXU pass).
    y = jnp.sum(h * w2_ref[...], axis=0, keepdims=True)      # (1, TB)
    o_ref[...] = (y + b2_ref[0, 0]).astype(o_ref.dtype)


def linear_lag_forward(x, w1, b1, w2, b2, *, batch_tile=None):
    """LinearLagModel forward pass.

    x : (B, D_in) float32
    w1: (H, D_in) float32   (torch nn.Linear weight convention)
    b1: (H,)      float32
    w2: (1, H)    float32
    b2: (1,)      float32
    returns (B, 1) float32
    """
    B, D_in = x.shape
    H = w1.shape[0]

    # --- batch tiling: lane-sized tiles, enough grid steps to pipeline ---
    if batch_tile is None:
        b_pad0 = _round_up(B, 128)
        # aim for ~8 pipeline steps, tile in [128, 2048], multiple of 128
        batch_tile = max(128, min(2048, _round_up(max(b_pad0 // 8, 1), 128)))
    batch_tile = _round_up(batch_tile, 128)
    B_pad = _round_up(B, batch_tile)
    grid = (B_pad // batch_tile,)

    # --- layout plumbing in the wrapper (batch onto the lane axis) ---
    xT = jnp.pad(x.T, ((0, 0), (0, B_pad - B)))              # (D_in, B_pad)
    b1c = b1.reshape(H, 1)
    w2c = w2.reshape(H, 1)
    b2c = b2.reshape(1, 1)

    # --- explicit VMEM budget (stays valid on v7x's 64 MiB physical VMEM) ---
    f32 = 4
    est_vmem = (
        2 * batch_tile * max(D_in, 8) * f32                  # double-buffered x tile
        + 2 * batch_tile * 8 * f32                           # double-buffered out tile (padded sublanes)
        + 2 * (H * max(D_in, 128) + 2 * H * 128) * f32       # resident w1/b1/w2 (padded)
    )
    vmem_limit = int(min(max(4 * est_vmem, 8 << 20), 32 << 20))

    cost = pl.CostEstimate(
        flops=2 * B_pad * D_in * H + 4 * B_pad * H,
        transcendentals=0,
        bytes_accessed=(B_pad * D_in + D_in * H + 2 * H + 1 + B_pad) * f32,
    )

    out = pl.pallas_call(
        _mlp_kernel,
        out_shape=jax.ShapeDtypeStruct((1, B_pad), jnp.float32),
        grid_spec=pltpu.PrefetchScalarGridSpec(
            num_scalar_prefetch=0,
            grid=grid,
            in_specs=[
                pl.BlockSpec((D_in, batch_tile), lambda i: (0, i)),   # x tile (lane-dense)
                pl.BlockSpec((H, D_in), lambda i: (0, 0)),            # w1, resident
                pl.BlockSpec((H, 1), lambda i: (0, 0)),               # b1, resident
                pl.BlockSpec((H, 1), lambda i: (0, 0)),               # w2, resident
                pl.BlockSpec(memory_space=pltpu.MemorySpace.SMEM),    # b2 scalar in SMEM
            ],
            out_specs=pl.BlockSpec((1, batch_tile), lambda i: (0, i)),
        ),
        compiler_params=pltpu.CompilerParams(
            dimension_semantics=("parallel",),
            vmem_limit_bytes=vmem_limit,
        ),
        cost_estimate=cost,
    )(xT, w1, b1c, w2c, b2c)

    # strip batch padding, restore (B, 1) like nn.Linear(hidden, 1)
    return out[0, :B].reshape(B, 1)


def init_params(key, input_dim, hidden_dim):
    """Deterministic init mirroring nn.Linear's U(-1/sqrt(fan_in), 1/sqrt(fan_in)),
    stored in torch convention: W1 (H, D_in), b1 (H,), W2 (1, H), b2 (1,)."""
    k1, k2, k3, k4 = jax.random.split(key, 4)
    bound1 = 1.0 / jnp.sqrt(jnp.float32(input_dim))
    bound2 = 1.0 / jnp.sqrt(jnp.float32(hidden_dim))
    w1 = jax.random.uniform(k1, (hidden_dim, input_dim), jnp.float32, -bound1, bound1)
    b1 = jax.random.uniform(k2, (hidden_dim,), jnp.float32, -bound1, bound1)
    w2 = jax.random.uniform(k3, (1, hidden_dim), jnp.float32, -bound2, bound2)
    b2 = jax.random.uniform(k4, (1,), jnp.float32, -bound2, bound2)
    return w1, b1, w2, b2


if __name__ == "__main__":
    key = jax.random.PRNGKey(0)
    kx, kp = jax.random.split(key)

    batch = 8
    input_dim = 16
    hidden_dim = 32

    x = jax.random.normal(kx, (batch, input_dim), jnp.float32)
    w1, b1, w2, b2 = init_params(kp, input_dim, hidden_dim)

    y = linear_lag_forward(x, w1, b1, w2, b2)
    y = jax.block_until_ready(y)

    # Pure-JAX reference (same math as the PyTorch module)
    ref = jnp.maximum(x @ w1.T + b1, 0.0) @ w2.T + b2
    assert y.shape == (batch, 1)
    assert jnp.allclose(y, ref, atol=1e-5, rtol=1e-5)

    print("KERNEL_OK")
</pallas_src>

<mosaic_0001>
module attributes {stable_mosaic.version = 11 : i64} {
  func.func @_mlp_kernel(%arg0: i32, %arg1: memref<16x128xf32, #tpu.memory_space<vmem>>, %arg2: memref<32x16xf32, #tpu.memory_space<vmem>>, %arg3: memref<32x1xf32, #tpu.memory_space<vmem>>, %arg4: memref<32x1xf32, #tpu.memory_space<vmem>>, %arg5: memref<1x1xf32, #tpu.memory_space<smem>>, %arg6: memref<1x128xf32, #tpu.memory_space<vmem>>) attributes {dimension_semantics = [#tpu.dimension_semantics<parallel>], iteration_bounds = array<i64: 1>, scalar_prefetch = 0 : i64, scratch_operands = 0 : i64, tpu.core_type = #tpu.core_type<tc>, window_params = [{transform_indices = @transform_0, window_bounds = array<i64: 16, 128>}, {pipeline_mode = #tpu.pipeline_mode<synchronous>, transform_indices = @transform_1, window_bounds = array<i64: 32, 16>}, {pipeline_mode = #tpu.pipeline_mode<synchronous>, transform_indices = @transform_2, window_bounds = array<i64: 32, 1>}, {pipeline_mode = #tpu.pipeline_mode<synchronous>, transform_indices = @transform_3, window_bounds = array<i64: 32, 1>}, {transform_indices = @transform_4, window_bounds = array<i64: 1, 1>}, {transform_indices = @transform_5, window_bounds = array<i64: 1, 128>}]} {
    %c0 = arith.constant 0 : index
    %c0_0 = arith.constant 0 : index
    %0 = vector.load %arg2[%c0, %c0_0] : memref<32x16xf32, #tpu.memory_space<vmem>>, vector<32x16xf32>
    %c0_1 = arith.constant 0 : index
    %c0_2 = arith.constant 0 : index
    %1 = vector.load %arg1[%c0_1, %c0_2] : memref<16x128xf32, #tpu.memory_space<vmem>>, vector<16x128xf32>
    %cst = arith.constant dense<0.000000e+00> : vector<32x128xf32>
    %2 = tpu.matmul %0, %1, %cst {dimension_numbers = #tpu.dot_dimension_numbers<[1], [0], [0], [1], [0, 0, 1, 1], [], []>} : vector<32x16xf32>, vector<16x128xf32>, vector<32x128xf32> -> vector<32x128xf32>
    %c0_3 = arith.constant 0 : index
    %c0_4 = arith.constant 0 : index
    %3 = vector.load %arg3[%c0_3, %c0_4] : memref<32x1xf32, #tpu.memory_space<vmem>>, vector<32x1xf32>
    %4 = vector.broadcast %3 : vector<32x1xf32> to vector<32x128xf32>
    %5 = arith.addf %2, %4 : vector<32x128xf32>
    %cst_5 = arith.constant 0.000000e+00 : f32
    %6 = vector.broadcast %cst_5 : f32 to vector<32x128xf32>
    %7 = arith.maximumf %5, %6 : vector<32x128xf32>
    %c0_6 = arith.constant 0 : index
    %c0_7 = arith.constant 0 : index
    %8 = vector.load %arg4[%c0_6, %c0_7] : memref<32x1xf32, #tpu.memory_space<vmem>>, vector<32x1xf32>
    %9 = vector.broadcast %8 : vector<32x1xf32> to vector<32x128xf32>
    %10 = arith.mulf %7, %9 : vector<32x128xf32>
    %cst_8 = arith.constant dense<0.000000e+00> : vector<128xf32>
    %11 = vector.multi_reduction <add>, %10, %cst_8 [0] : vector<32x128xf32> to vector<128xf32>
    %12 = vector.shape_cast %11 : vector<128xf32> to vector<1x128xf32>
    %c0_9 = arith.constant 0 : index
    %c0_10 = arith.constant 0 : index
    %13 = memref.load %arg5[%c0_9, %c0_10] : memref<1x1xf32, #tpu.memory_space<smem>>
    %14 = vector.broadcast %13 : f32 to vector<1x128xf32>
    %15 = arith.addf %12, %14 : vector<1x128xf32>
    %c0_11 = arith.constant 0 : index
    %c0_12 = arith.constant 0 : index
    %16 = vector.load %arg6[%c0_11, %c0_12] : memref<1x128xf32, #tpu.memory_space<vmem>>, vector<1x128xf32>
    tpu.vector_store %arg6[%c0_11, %c0_12], %15 {strides = array<i32>} : memref<1x128xf32, #tpu.memory_space<vmem>>, vector<1x128xf32>,
    return
  }
  func.func @transform_0(%arg0: i32) -> (i32, i32) {
    %c0_i32 = arith.constant 0 : i32
    %c0_i32_0 = arith.constant 0 : i32
    return %c0_i32, %arg0 : i32, i32
  }
  func.func @transform_1(%arg0: i32) -> (i32, i32) {
    %c0_i32 = arith.constant 0 : i32
    %c0_i32_0 = arith.constant 0 : i32
    %c0_i32_1 = arith.constant 0 : i32
    return %c0_i32, %c0_i32_0 : i32, i32
  }
  func.func @transform_2(%arg0: i32) -> (i32, i32) {
    %c0_i32 = arith.constant 0 : i32
    %c0_i32_0 = arith.constant 0 : i32
    %c0_i32_1 = arith.constant 0 : i32
    return %c0_i32, %c0_i32_0 : i32, i32
  }
  func.func @transform_3(%arg0: i32) -> (i32, i32) {
    %c0_i32 = arith.constant 0 : i32
    %c0_i32_0 = arith.constant 0 : i32
    %c0_i32_1 = arith.constant 0 : i32
    return %c0_i32, %c0_i32_0 : i32, i32
  }
  func.func @transform_4(%arg0: i32) -> (i32, i32) {
    %c0_i32 = arith.constant 0 : i32
    %c0_i32_0 = arith.constant 0 : i32
    %c0_i32_1 = arith.constant 0 : i32
    return %c0_i32, %c0_i32_0 : i32, i32
  }
  func.func @transform_5(%arg0: i32) -> (i32, i32) {
    %c0_i32 = arith.constant 0 : i32
    %c0_i32_0 = arith.constant 0 : i32
    return %c0_i32, %arg0 : i32, i32
  }
}

</mosaic_0001>

<bundles_post_ra>
// kernel: tpu_custom_call.1
= control target key start
LH: loop header
LB: loop body
LE: loop exit
PB: predicated region body
PF: predicated region fallthrough
CT: control target
= control target key end

     0   :  { %vm52_vm0 = vcmask 130048   ;;  %s339_s0 = inlined_call_operand.vmem [shape: f32[16,128], index: 0, kind: input, shape index: {}]   ;;  %s340_s1 = inlined_call_operand.vmem [shape: f32[32,16], index: 1, kind: input, shape index: {}]   ;;  %s341_s2 = inlined_call_operand.vmem [shape: f32[32,1], index: 2, kind: input, shape index: {}]   ;;  %s342_s3 = inlined_call_operand.vmem [shape: f32[32,1], index: 3, kind: input, shape index: {}]   ;;  %s343_s4 = inlined_call_operand.<no memory space> [shape: f32[1,1], index: 4, kind: input, shape index: {}]   ;;  %s344_s5 = inlined_call_operand.hbm [shape: f32[1,128], index: 5, kind: output, shape index: {}]  }
   0x1   :  { %v27_v0 = vld [vmem:[%s339_s0 + $0x8] sm:$0xff]  ;;  %v26_v1 = vld [vmem:[%s339_s0] sm:$0xff]  ;;  %v24_v3 = vld [vmem:[%s340_s1 + $0x10] sm:$0xff] }
   0x2   :  { %219 = vmatprep.subr.mxu0 %v27_v0  ;;  %229 = vmatprep.subr.mxu1 %v27_v0  ;;  %v22_v2 = vld [vmem:[%s340_s1] sm:$0xff]  ;;  %v23_v4 = vld [vmem:[%s340_s1 + $0x8] sm:$0xff]  ;;  %v25_v5 = vld [vmem:[%s340_s1 + $0x18] sm:$0xff] }
   0x3   :  { %220 = vmatpush3.msra.mxu0 %v27_v0  ;;  %231 = vmatpush3.msra.mxu1 %v27_v0 }
   0x4   :  { %221 = vmatprep.subr.mxu0 %v26_v1  ;;  %230 = vmatprep.subr.mxu1 %v26_v1 }
   0x5   :  { %222 = vmatpush3.msra.mxu0 %v26_v1  ;;  %232 = vmatpush3.msra.mxu1 %v26_v1 }
   0x6   :  { %11 = vsyncpa [#allocation4], 0  ;;  %223 = vmatprep.mubr.msk.f32.mxu0 %vm52_vm0, %v22_v2  ;;  %226 = vmatprep.mubr.msk.f32.mxu1 %vm52_vm0, %v24_v3  ;;  %v28_v6 = vld [vmem:[%s341_s2] sm:$0xff]  ;;  %v30_v7 = vld [vmem:[%s341_s2 + $0x10] sm:$0xff]  ;;  %v259_v8 = vmov 0   ;;  %v192_v47 = vstv %s343_s4  ;;  %s260_s19 = smov [#allocation3]  }
   0x7   :  { %224 = vmatmul.mubr.msk.f32.vlgmr.msra.gmra.mxu0 %vm52_vm0, %v23_v4  ;;  %227 = vmatmul.mubr.msk.f32.vlgmr.msra.gmra.mxu1 %vm52_vm0, %v25_v5  ;;  %v29_v9 = vld [vmem:[%s341_s2 + $0x8] sm:$0xff]  ;;  %v31_v10 = vld [vmem:[%s341_s2 + $0x18] sm:$0xff]  ;;  %v154_v11 = vld [vmem:[%s342_s3] sm:$0xff]  ;;  %s201_s20 = sshll.u32 %s260_s19, 4  ;;  %s202_s20 = int_to_ptr.vmem [resolvable:$true] %s201_s20 }
   0x8   :  { %235 = vset.pattern.permute.xlu0 %v259_v8  ;;  %236 = vset.pattern.permute.xlu1 %v259_v8  ;;  %v155_v12 = vld [vmem:[%s342_s3 + $0x8] sm:$0xff]  ;;  %v156_v13 = vld [vmem:[%s342_s3 + $0x10] sm:$0xff]  ;;  %v157_v14 = vld [vmem:[%s342_s3 + $0x18] sm:$0xff]  ;;  %s237_s21 = scalar_lea.vmem %s202_s20, 16  ;;  %s241_s22 = scalar_lea.vmem %s202_s20, 32 }
   0x9   :  { %34 = vperm.xlu0 %235, %v28_v6   ;;  %44 = vperm.xlu1 %236, %v30_v7   ;;  %p238_p0 = scmp.ne.s32.totalorder %s202_s20, %s237_s21  ;;  %p242_p1 = scmp.lt.s32.totalorder %s202_s20, %s202_s20 }
   0xa   :  { %p243_p2 = scmp.lt.s32.totalorder %s241_s22, %s237_s21 }
   0xc   :  { %p244_p3 = por %p243_p2, %p242_p1 }
   0xd   :  { %39 = vperm.xlu0 %235, %v29_v9   ;;  %49 = vperm.xlu1 %236, %v31_v10  }
   0xe   :  { %p245_p4 = pnand %p244_p3, %p238_p0 }
  0x11   :  { %160 = vperm.xlu0 %235, %v154_v11   ;;  %165 = vperm.xlu1 %236, %v155_v12  }
  0x15   :  { %170 = vperm.xlu0 %235, %v156_v13   ;;  %175 = vperm.xlu1 %236, %v157_v14  }
  0x84   :  { %v35_v15 = vpop.permute.xlu0 %34  ;;  %v45_v16 = vpop.permute.xlu1 %44 }
  0x88   :  { %v40_v17 = vpop.permute.xlu0 %39  ;;  %v50_v18 = vpop.permute.xlu1 %49 }
  0x8c   :  { %v161_v21 = vpop.permute.xlu0 %160  ;;  %v166_v29 = vpop.permute.xlu1 %165 }
  0x90   :  { %v171_v35 = vpop.permute.xlu0 %170  ;;  %v176_v38 = vpop.permute.xlu1 %175 }
  0xc7   :  { %v225_v19 = vpop.f32.mrf.mxu0  ;;  %v228_v20 = vpop.f32.mrf.mxu1 }
  0xc8   :  { %v137_v22 = vadd.f32 %v225_v19, %v40_v17  ;;  %v147_v26 = vadd.f32 %v228_v20, %v50_v18 }
  0xc9   :  { %v131_v23 = vpop.f32.mrf.mxu0  ;;  %v141_v24 = vpop.f32.mrf.mxu1 }
  0xca   :  { %v151_v25 = vmax.f32 %v137_v22, 0.0  ;;  %v132_v27 = vadd.f32 %v131_v23, %v35_v15  ;;  %v142_v28 = vadd.f32 %v141_v24, %v45_v16  ;;  %v153_v33 = vmax.f32 %v147_v26, 0.0 }
  0xcc   :  { %v150_v30 = vmax.f32 %v132_v27, 0.0  ;;  %v152_v31 = vmax.f32 %v142_v28, 0.0  ;;  %v179_v32 = vmul.f32 %v166_v29, %v151_v25  ;;  %v181_v39 = vmul.f32 %v176_v38, %v153_v33 }
  0xce   :  { %v178_v34 = vmul.f32 %v161_v21, %v150_v30  ;;  %v180_v37 = vmul.f32 %v171_v35, %v152_v31 }
  0xd0   :  { %v182_v36 = vadd.f32 %v179_v32, %v178_v34 }
  0xd2   :  { %v183_v40 = vadd.f32 %v182_v36, %v180_v37 }
  0xd4   :  { %v184_v41 = vadd.f32 %v183_v40, %v181_v39 }
  0xd6   :  { %v185_v42 = vrot.slane %v184_v41, 4 }
  0xd8   :  { %v186_v43 = vadd.f32 %v185_v42, %v184_v41 }
  0xda   :  { %v187_v44 = vrot.slane %v186_v43, 2 }
  0xdc   :  { %v188_v45 = vadd.f32 %v187_v44, %v186_v43 }
  0xde   :  { %v189_v46 = vrot.slane %v188_v45, 1 }
  0xe0   :  { %v190_v48 = vadd.f32 %v189_v46, %v188_v45 }
  0xe2   :  { %v193_v49 = vadd.f32 %v192_v47, %v190_v48 }
  0xe4   :  { %194 = vst [vmem:[#allocation3] sm:$0x1] %v193_v49 }
  0xe5   :  { %248 = shalt.err (!%p245_p4)
}
  0xe6   :  { %204 = dma.vmem_to_hbm [thread:$0]  %s202_s20, 16, %s344_s5, [#allocation4]  }
  0xe7   :  { %257 = dma.done.wait [#allocation4], 16  }
  0xe8   :  { %258 = vsyncadd [#allocation4], 4294967280 }
  0xe9   :  { %208 = vsyncpa [#allocation4], 1 }

</bundles_post_ra>
